<compile_context>
chip_gen: v7x
topology: tpu7x:2x2x1
jax: 0.10.0
libtpu: 0.0.40
codegen_flags: <defaults>
</compile_context>

<pallas_src>
import jax
import jax.numpy as jnp
from jax.experimental import pallas as pl
from jax.experimental.pallas import tpu as pltpu


_LANE = 128
_MAX_TR = 1024                      # upper bound on rows per grid step
_VMEM_INPUT_BUDGET = 8 * 1024 * 1024  # bytes for double-buffered input tiles


def _sublane_multiple(dtype):
    """Sublane granularity for a dtype (8 for f32, 16 for bf16, 32 for int8/fp8)."""
    item = jnp.dtype(dtype).itemsize
    return max(8, 32 // max(item, 1))


def _make_group_kernel(num_preds, tr, rows, rt_per_core, need_mask):
    """Kernel computing sum((pred_j - gt)^2) per-lane partials for P predictions."""

    def kernel(*refs):
        pred_refs = refs[:num_preds]
        gt_ref = refs[num_preds]
        out_ref = refs[num_preds + 1]     # (1, P, 1, 128) block, resident per core
        acc_ref = refs[num_preds + 2]     # (NC, P, 1, 128) VMEM scratch

        c = pl.program_id(0)              # core-split axis ("parallel")
        r = pl.program_id(1)              # row-tile reduction axis ("arbitrary")

        @pl.when(r == 0)
        def _init():
            for j in range(num_preds):
                acc_ref[c, j] = jnp.zeros((1, _LANE), jnp.float32)

        gt = gt_ref[...].astype(jnp.float32)

        if need_mask:
            # Last row tile may extend past the array; zero its contribution.
            row0 = (c * rt_per_core + r) * tr
            rid = jax.lax.broadcasted_iota(jnp.int32, (tr, _LANE), 0) + row0
            valid = rid < rows

        for j in range(num_preds):
            d = pred_refs[j][...].astype(jnp.float32) - gt
            sq = d * d
            if need_mask:
                sq = jnp.where(valid, sq, 0.0)
            # Per-lane partial sums only (VPU adds + one intra-vreg sublane fold);
            # the cross-lane reduce happens once in the wrapper.
            acc_ref[c, j] += jnp.sum(sq, axis=0, keepdims=True)

        @pl.when(r == rt_per_core - 1)
        def _finalize():
            for j in range(num_preds):
                out_ref[0, j] = acc_ref[c, j]

    return kernel


def mse_loss_group_pallas(pred_list, gt, max_rows_per_step=_MAX_TR):
    """MSE(pred_j, gt) (reduction='mean') for every pred_j sharing one gt frame.

    Returns a (P,) float32 array of per-prediction MSE values, computed by a single
    Pallas kernel that reads gt from HBM exactly once.
    """
    num_preds = len(pred_list)
    assert num_preds >= 1
    gt = jnp.asarray(gt)
    preds = [jnp.asarray(p) for p in pred_list]
    for p in preds:
        assert p.shape == gt.shape, (p.shape, gt.shape)

    n = int(gt.size)

    pad = (-n) % _LANE

    def to_2d(x):
        flat = x.reshape(-1)
        if pad:
            # TODO(synk): this pad is an extra HBM copy; element counts that are a
            # multiple of 128 (typical depth maps) skip it entirely.
            flat = jnp.pad(flat, (0, pad))
        return flat.reshape(-1, _LANE)

    preds2d = [to_2d(p) for p in preds]
    gt2d = to_2d(gt)
    rows = gt2d.shape[0]

    # --- choose the row tile ------------------------------------------------
    sub = max(_sublane_multiple(a.dtype) for a in preds + [gt])
    bytes_per_row = _LANE * 4                      # budget for worst-case f32 tiles
    budget_rows = _VMEM_INPUT_BUDGET // (2 * (num_preds + 1) * bytes_per_row)
    tr_cap = min(max_rows_per_step, budget_rows)
    tr_cap = max(sub, (tr_cap // sub) * sub)
    if rows <= tr_cap:
        tr = rows            # single full-extent block (always a legal block shape)
    else:
        tr = tr_cap          # sublane-aligned tile

    total_blocks = pl.cdiv(rows, tr)

    # Split the reduction across 2 TensorCores (v7x) only when it divides evenly,
    # so no grid step is entirely out of bounds.  No-op on 1-core chips.
    nc = 2 if (total_blocks >= 4 and total_blocks % 2 == 0) else 1
    rt_per_core = total_blocks // nc
    need_mask = (total_blocks * tr != rows)

    kernel = _make_group_kernel(num_preds, tr, rows, rt_per_core, need_mask)

    def row_map(c, r):
        return (c * rt_per_core + r, 0)

    in_specs = [pl.BlockSpec((tr, _LANE), row_map) for _ in range(num_preds + 1)]
    out_spec = pl.BlockSpec((1, num_preds, 1, _LANE), lambda c, r: (c, 0, 0, 0))

    out = pl.pallas_call(
        kernel,
        out_shape=jax.ShapeDtypeStruct((nc, num_preds, 1, _LANE), jnp.float32),
        grid_spec=pltpu.PrefetchScalarGridSpec(
            num_scalar_prefetch=0,
            grid=(nc, rt_per_core),
            in_specs=in_specs,
            out_specs=out_spec,
            scratch_shapes=[pltpu.VMEM((nc, num_preds, 1, _LANE), jnp.float32)],
        ),
        compiler_params=pltpu.CompilerParams(
            dimension_semantics=("parallel", "arbitrary"),
            vmem_limit_bytes=32 * 1024 * 1024,
        ),
    )(*preds2d, gt2d)

    ssq = jnp.sum(out, axis=(0, 2, 3))             # single cross-lane reduce, (P,)
    return ssq / jnp.float32(n)


def mse_loss_pallas(pred, gt, max_rows_per_step=_MAX_TR):
    """MSE(pred, gt) with reduction='mean' for a single pair."""
    return mse_loss_group_pallas([pred], gt, max_rows_per_step=max_rows_per_step)[0]


class MseDepthSequenceLoss:
    """JAX/Pallas equivalent of Mse_Depth_sequence_loss (weight = 1.0)."""

    def __init__(self):
        self.weight = 1.0

    def __call__(self, inputs, outputs, mode="train"):
        output_image_sequence_list = outputs["depth"]
        if not isinstance(output_image_sequence_list, list):
            output_image_sequence_list = [[output_image_sequence_list]]

        loss_list = []
        pair_keys = []
        for sequence_id, pred_rgb_list in enumerate(output_image_sequence_list):
            gt_image = inputs["depth"][:, 2 + sequence_id]
            preds = list(pred_rgb_list)
            # One fused kernel per sequence: all intermediate predictions share gt.
            mses = mse_loss_group_pallas(preds, gt_image)      # (P,) device array
            for intermidiate_id in range(len(preds)):
                inverse_intermidiate_id = len(preds) - intermidiate_id - 1
                loss_list.append(mses[intermidiate_id])
                pair_keys.append(
                    "additional_info_{}/depth_mse_t{}_module_index_{}".format(
                        mode, 2 + sequence_id, inverse_intermidiate_id))

        mean_loss = sum(loss_list) / len(loss_list)
        weighted_loss = mean_loss * self.weight

        # Single host sync for every logged scalar (instead of one per loss).
        host_vals = jax.device_get(
            jnp.stack(loss_list + [mean_loss, weighted_loss]))

        loss_dict = {}
        if mode == "train" or mode == "val":
            for key, val in zip(pair_keys, host_vals[: len(loss_list)]):
                loss_dict[key] = float(val)
        loss_dict["{}/depth_mse".format(mode)] = float(host_vals[-2])
        loss_dict["{}/loss".format(mode)] = float(host_vals[-2])
        loss_dict["{}/weight_depth_mse".format(mode)] = float(host_vals[-1])
        loss_dict["{}/weight_loss".format(mode)] = float(host_vals[-1])
        return weighted_loss, loss_dict


if __name__ == "__main__":
    key = jax.random.PRNGKey(0)

    # --- module-level test (matches the PyTorch forward) --------------------
    B, T, H, W = 2, 4, 16, 16          # inputs['depth']: [B, T, H, W]
    n_sequences = 2                    # uses gt frames t=2 and t=3
    n_intermediate = 2                 # predictions per sequence

    k_gt, k_pred, k_extra = jax.random.split(key, 3)
    depth_gt = jax.random.normal(k_gt, (B, T, H, W), dtype=jnp.float32)

    pred_keys = jax.random.split(k_pred, n_sequences * n_intermediate)
    output_depth = []
    idx = 0
    for _ in range(n_sequences):
        seq_preds = []
        for _ in range(n_intermediate):
            seq_preds.append(
                jax.random.normal(pred_keys[idx], (B, H, W), dtype=jnp.float32))
            idx += 1
        output_depth.append(seq_preds)

    inputs = {"depth": depth_gt}
    outputs = {"depth": output_depth}

    loss_fn = MseDepthSequenceLoss()
    loss, loss_dict = loss_fn(inputs, outputs, mode="train")
    loss = jax.block_until_ready(loss)

    ref_losses = []
    for s in range(n_sequences):
        gt = depth_gt[:, 2 + s]
        for p in output_depth[s]:
            ref_losses.append(jnp.mean((p - gt) ** 2))
    ref = sum(ref_losses) / len(ref_losses)
    assert jnp.allclose(loss, ref, rtol=1e-5, atol=1e-5), (loss, ref)

    # --- extra path checks: multi-step grid, 2-core split, ragged mask, pad ----
    def _ref_mse(p, g):
        return jnp.mean((p.astype(jnp.float32) - g.astype(jnp.float32)) ** 2)

    ks = jax.random.split(k_extra, 8)

    # (a) multi-step grid + 2-core split (rows=64, tr=8 -> 8 blocks, NC=2), P=3
    g_a = jax.random.normal(ks[0], (64, 128), dtype=jnp.float32)
    p_a = [jax.random.normal(ks[1 + i], (64, 128), dtype=jnp.float32)
           for i in range(3)]
    got_a = jax.block_until_ready(
        mse_loss_group_pallas(p_a, g_a, max_rows_per_step=8))
    for i in range(3):
        assert jnp.allclose(got_a[i], _ref_mse(p_a[i], g_a), rtol=1e-5, atol=1e-5)

    # (b) ragged last row tile handled by the in-kernel mask (rows=36, tr=8)
    g_b = jax.random.normal(ks[4], (36, 128), dtype=jnp.float32)
    p_b = jax.random.normal(ks[5], (36, 128), dtype=jnp.float32)
    got_b = jax.block_until_ready(mse_loss_pallas(p_b, g_b, max_rows_per_step=8))
    assert jnp.allclose(got_b, _ref_mse(p_b, g_b), rtol=1e-5, atol=1e-5)

    # (c) element count not a multiple of 128 (falls back to a zero pad)
    g_c = jax.random.normal(ks[6], (1000,), dtype=jnp.float32)
    p_c = jax.random.normal(ks[7], (1000,), dtype=jnp.float32)
    got_c = jax.block_until_ready(mse_loss_pallas(p_c, g_c))
    assert jnp.allclose(got_c, _ref_mse(p_c, g_c), rtol=1e-5, atol=1e-5)

    # (d) bf16 inputs go through the kernel uncast (no wrapper-side f32 copy)
    g_d = jax.random.normal(ks[0], (16, 128), dtype=jnp.float32).astype(jnp.bfloat16)
    p_d = jax.random.normal(ks[1], (16, 128), dtype=jnp.float32).astype(jnp.bfloat16)
    got_d = jax.block_until_ready(mse_loss_pallas(p_d, g_d))
    assert jnp.allclose(got_d, _ref_mse(p_d, g_d), rtol=1e-2, atol=1e-3)

    print("KERNEL_OK")
</pallas_src>

<mosaic_0001>
module attributes {stable_mosaic.version = 11 : i64} {
  func.func @kernel(%arg0: i32, %arg1: i32, %arg2: memref<4x128xf32, #tpu.memory_space<vmem>>, %arg3: memref<4x128xf32, #tpu.memory_space<vmem>>, %arg4: memref<4x128xf32, #tpu.memory_space<vmem>>, %arg5: memref<1x2x1x128xf32, #tpu.memory_space<vmem>>, %arg6: memref<1x2x1x128xf32, #tpu.memory_space<vmem>>) attributes {dimension_semantics = [#tpu.dimension_semantics<parallel>, #tpu.dimension_semantics<arbitrary>], iteration_bounds = array<i64: 1, 1>, scalar_prefetch = 0 : i64, scratch_operands = 1 : i64, tpu.core_type = #tpu.core_type<tc>, window_params = [{transform_indices = @transform_0, window_bounds = array<i64: 4, 128>}, {transform_indices = @transform_1, window_bounds = array<i64: 4, 128>}, {transform_indices = @transform_2, window_bounds = array<i64: 4, 128>}, {transform_indices = @transform_3, window_bounds = array<i64: 1, 2, 1, 128>}]} {
    %c0_i32 = arith.constant 0 : i32
    %0 = arith.cmpi eq, %arg1, %c0_i32 : i32
    %1 = arith.extui %0 : i1 to i32
    %c0_i32_0 = arith.constant 0 : i32
    %2 = arith.cmpi ne, %1, %c0_i32_0 : i32
    scf.if %2 {
      %cst_20 = arith.constant 0.000000e+00 : f32
      %33 = vector.broadcast %cst_20 : f32 to vector<1x128xf32>
      %34 = arith.index_cast %arg0 : i32 to index
      %c0_21 = arith.constant 0 : index
      %c0_22 = arith.constant 0 : index
      %c0_23 = arith.constant 0 : index
      %35 = vector.load %arg6[%34, %c0_21, %c0_22, %c0_23] : memref<1x2x1x128xf32, #tpu.memory_space<vmem>>, vector<1x1x1x128xf32>
      %36 = vector.shape_cast %35 : vector<1x1x1x128xf32> to vector<1x128xf32>
      %37 = vector.shape_cast %33 : vector<1x128xf32> to vector<1x1x1x128xf32>
      tpu.vector_store %arg6[%34, %c0_21, %c0_22, %c0_23], %37 {strides = array<i32>} : memref<1x2x1x128xf32, #tpu.memory_space<vmem>>, vector<1x1x1x128xf32>,
      %cst_24 = arith.constant 0.000000e+00 : f32
      %38 = vector.broadcast %cst_24 : f32 to vector<1x128xf32>
      %39 = arith.index_cast %arg0 : i32 to index
      %c1_25 = arith.constant 1 : index
      %c0_26 = arith.constant 0 : index
      %c0_27 = arith.constant 0 : index
      %40 = vector.load %arg6[%39, %c1_25, %c0_26, %c0_27] : memref<1x2x1x128xf32, #tpu.memory_space<vmem>>, vector<1x1x1x128xf32>
      %41 = vector.shape_cast %40 : vector<1x1x1x128xf32> to vector<1x128xf32>
      %42 = vector.shape_cast %38 : vector<1x128xf32> to vector<1x1x1x128xf32>
      tpu.vector_store %arg6[%39, %c1_25, %c0_26, %c0_27], %42 {strides = array<i32>} : memref<1x2x1x128xf32, #tpu.memory_space<vmem>>, vector<1x1x1x128xf32>,
    } else {
    }
    %c0 = arith.constant 0 : index
    %c0_1 = arith.constant 0 : index
    %3 = vector.load %arg4[%c0, %c0_1] : memref<4x128xf32, #tpu.memory_space<vmem>>, vector<4x128xf32>
    %c0_2 = arith.constant 0 : index
    %c0_3 = arith.constant 0 : index
    %4 = vector.load %arg2[%c0_2, %c0_3] : memref<4x128xf32, #tpu.memory_space<vmem>>, vector<4x128xf32>
    %5 = arith.subf %4, %3 : vector<4x128xf32>
    %6 = arith.mulf %5, %5 : vector<4x128xf32>
    %7 = arith.index_cast %arg0 : i32 to index
    %c0_4 = arith.constant 0 : index
    %c0_5 = arith.constant 0 : index
    %c0_6 = arith.constant 0 : index
    %8 = vector.load %arg6[%7, %c0_4, %c0_5, %c0_6] : memref<1x2x1x128xf32, #tpu.memory_space<vmem>>, vector<1x1x1x128xf32>
    %9 = vector.shape_cast %8 : vector<1x1x1x128xf32> to vector<1x128xf32>
    %cst = arith.constant dense<0.000000e+00> : vector<128xf32>
    %10 = vector.multi_reduction <add>, %6, %cst [0] : vector<4x128xf32> to vector<128xf32>
    %11 = vector.shape_cast %10 : vector<128xf32> to vector<1x128xf32>
    %12 = arith.addf %9, %11 : vector<1x128xf32>
    %13 = arith.index_cast %arg0 : i32 to index
    %c0_7 = arith.constant 0 : index
    %c0_8 = arith.constant 0 : index
    %c0_9 = arith.constant 0 : index
    %14 = vector.load %arg6[%13, %c0_7, %c0_8, %c0_9] : memref<1x2x1x128xf32, #tpu.memory_space<vmem>>, vector<1x1x1x128xf32>
    %15 = vector.shape_cast %14 : vector<1x1x1x128xf32> to vector<1x128xf32>
    %16 = vector.shape_cast %12 : vector<1x128xf32> to vector<1x1x1x128xf32>
    tpu.vector_store %arg6[%13, %c0_7, %c0_8, %c0_9], %16 {strides = array<i32>} : memref<1x2x1x128xf32, #tpu.memory_space<vmem>>, vector<1x1x1x128xf32>,
    %c0_10 = arith.constant 0 : index
    %c0_11 = arith.constant 0 : index
    %17 = vector.load %arg3[%c0_10, %c0_11] : memref<4x128xf32, #tpu.memory_space<vmem>>, vector<4x128xf32>
    %18 = arith.subf %17, %3 : vector<4x128xf32>
    %19 = arith.mulf %18, %18 : vector<4x128xf32>
    %20 = arith.index_cast %arg0 : i32 to index
    %c1 = arith.constant 1 : index
    %c0_12 = arith.constant 0 : index
    %c0_13 = arith.constant 0 : index
    %21 = vector.load %arg6[%20, %c1, %c0_12, %c0_13] : memref<1x2x1x128xf32, #tpu.memory_space<vmem>>, vector<1x1x1x128xf32>
    %22 = vector.shape_cast %21 : vector<1x1x1x128xf32> to vector<1x128xf32>
    %cst_14 = arith.constant dense<0.000000e+00> : vector<128xf32>
    %23 = vector.multi_reduction <add>, %19, %cst_14 [0] : vector<4x128xf32> to vector<128xf32>
    %24 = vector.shape_cast %23 : vector<128xf32> to vector<1x128xf32>
    %25 = arith.addf %22, %24 : vector<1x128xf32>
    %26 = arith.index_cast %arg0 : i32 to index
    %c1_15 = arith.constant 1 : index
    %c0_16 = arith.constant 0 : index
    %c0_17 = arith.constant 0 : index
    %27 = vector.load %arg6[%26, %c1_15, %c0_16, %c0_17] : memref<1x2x1x128xf32, #tpu.memory_space<vmem>>, vector<1x1x1x128xf32>
    %28 = vector.shape_cast %27 : vector<1x1x1x128xf32> to vector<1x128xf32>
    %29 = vector.shape_cast %25 : vector<1x128xf32> to vector<1x1x1x128xf32>
    tpu.vector_store %arg6[%26, %c1_15, %c0_16, %c0_17], %29 {strides = array<i32>} : memref<1x2x1x128xf32, #tpu.memory_space<vmem>>, vector<1x1x1x128xf32>,
    %c0_i32_18 = arith.constant 0 : i32
    %30 = arith.cmpi eq, %arg1, %c0_i32_18 : i32
    %31 = arith.extui %30 : i1 to i32
    %c0_i32_19 = arith.constant 0 : i32
    %32 = arith.cmpi ne, %31, %c0_i32_19 : i32
    scf.if %32 {
      %33 = arith.index_cast %arg0 : i32 to index
      %c0_20 = arith.constant 0 : index
      %c0_21 = arith.constant 0 : index
      %c0_22 = arith.constant 0 : index
      %34 = vector.load %arg6[%33, %c0_20, %c0_21, %c0_22] : memref<1x2x1x128xf32, #tpu.memory_space<vmem>>, vector<1x1x1x128xf32>
      %35 = vector.shape_cast %34 : vector<1x1x1x128xf32> to vector<1x128xf32>
      %c0_23 = arith.constant 0 : index
      %c0_24 = arith.constant 0 : index
      %c0_25 = arith.constant 0 : index
      %c0_26 = arith.constant 0 : index
      %36 = vector.load %arg5[%c0_23, %c0_24, %c0_25, %c0_26] : memref<1x2x1x128xf32, #tpu.memory_space<vmem>>, vector<1x1x1x128xf32>
      %37 = vector.shape_cast %36 : vector<1x1x1x128xf32> to vector<1x128xf32>
      %38 = vector.shape_cast %35 : vector<1x128xf32> to vector<1x1x1x128xf32>
      tpu.vector_store %arg5[%c0_23, %c0_24, %c0_25, %c0_26], %38 {strides = array<i32>} : memref<1x2x1x128xf32, #tpu.memory_space<vmem>>, vector<1x1x1x128xf32>,
      %39 = arith.index_cast %arg0 : i32 to index
      %c1_27 = arith.constant 1 : index
      %c0_28 = arith.constant 0 : index
      %c0_29 = arith.constant 0 : index
      %40 = vector.load %arg6[%39, %c1_27, %c0_28, %c0_29] : memref<1x2x1x128xf32, #tpu.memory_space<vmem>>, vector<1x1x1x128xf32>
      %41 = vector.shape_cast %40 : vector<1x1x1x128xf32> to vector<1x128xf32>
      %c0_30 = arith.constant 0 : index
      %c1_31 = arith.constant 1 : index
      %c0_32 = arith.constant 0 : index
      %c0_33 = arith.constant 0 : index
      %42 = vector.load %arg5[%c0_30, %c1_31, %c0_32, %c0_33] : memref<1x2x1x128xf32, #tpu.memory_space<vmem>>, vector<1x1x1x128xf32>
      %43 = vector.shape_cast %42 : vector<1x1x1x128xf32> to vector<1x128xf32>
      %44 = vector.shape_cast %41 : vector<1x128xf32> to vector<1x1x1x128xf32>
      tpu.vector_store %arg5[%c0_30, %c1_31, %c0_32, %c0_33], %44 {strides = array<i32>} : memref<1x2x1x128xf32, #tpu.memory_space<vmem>>, vector<1x1x1x128xf32>,
    } else {
    }
    return
  }
  func.func @transform_0(%arg0: i32, %arg1: i32) -> (i32, i32) {
    %c1_i32 = arith.constant 1 : i32
    %0 = arith.muli %arg0, %c1_i32 : i32
    %1 = arith.addi %0, %arg1 : i32
    %c0_i32 = arith.constant 0 : i32
    %c0_i32_0 = arith.constant 0 : i32
    return %1, %c0_i32 : i32, i32
  }
  func.func @transform_1(%arg0: i32, %arg1: i32) -> (i32, i32) {
    %c1_i32 = arith.constant 1 : i32
    %0 = arith.muli %arg0, %c1_i32 : i32
    %1 = arith.addi %0, %arg1 : i32
    %c0_i32 = arith.constant 0 : i32
    %c0_i32_0 = arith.constant 0 : i32
    return %1, %c0_i32 : i32, i32
  }
  func.func @transform_2(%arg0: i32, %arg1: i32) -> (i32, i32) {
    %c1_i32 = arith.constant 1 : i32
    %0 = arith.muli %arg0, %c1_i32 : i32
    %1 = arith.addi %0, %arg1 : i32
    %c0_i32 = arith.constant 0 : i32
    %c0_i32_0 = arith.constant 0 : i32
    return %1, %c0_i32 : i32, i32
  }
  func.func @transform_3(%arg0: i32, %arg1: i32) -> (i32, i32, i32, i32) {
    %c0_i32 = arith.constant 0 : i32
    %c0_i32_0 = arith.constant 0 : i32
    %c0_i32_1 = arith.constant 0 : i32
    %c0_i32_2 = arith.constant 0 : i32
    return %arg0, %c0_i32, %c0_i32_0, %c0_i32_1 : i32, i32, i32, i32
  }
}

</mosaic_0001>

<bundles_post_ra>
// kernel: tpu_custom_call.1
= control target key start
LH: loop header
LB: loop body
LE: loop exit
PB: predicated region body
PF: predicated region fallthrough
CT: control target
= control target key end

     0   :  { %8 = vsyncpa [#allocation4], 0  ;;  %s283_s0 = inlined_call_operand.hbm [shape: f32[4,128], index: 0, kind: input, shape index: {}]   ;;  %s284_s1 = inlined_call_operand.hbm [shape: f32[4,128], index: 1, kind: input, shape index: {}]   ;;  %s285_s2 = inlined_call_operand.vmem [shape: f32[4,128], index: 2, kind: input, shape index: {}]   ;;  %s286_s3 = inlined_call_operand.hbm [shape: f32[1,2,1,128], index: 3, kind: output, shape index: {}]  }
   0x1   :  { %9 = vsyncpa [#allocation7], 0 }
   0x2   :  { %10 = vsyncpa [#allocation5], 0  ;;  %s218_s12 = smov [#allocation3]   ;;  %s219_s14 = smov [#allocation6]  }
   0x3   :  { %s20_s13 = sshll.u32 %s218_s12, 4  ;;  %s33_s15 = sshll.u32 %s219_s14, 4  ;;  %s21_s13 = int_to_ptr.vmem [resolvable:$true] %s20_s13  ;;  %s34_s15 = int_to_ptr.vmem [resolvable:$true] %s33_s15 }
   0x4   :  { %s146_s18 = scalar_lea.hbm %s283_s0, 64 }
   0x5   :  { %p147_p0 = scmp.ne.s32.totalorder %s283_s0, %s146_s18  ;;  %p150_p1 = scmp.lt.u32.totalorder %s146_s18, %s283_s0 }
   0x7   :  { %p152_p2 = pnand %p150_p1, %p147_p0 }
   0x9   :  { %155 = shalt.err (!%p152_p2)
}
   0xa   :  { %s156_s23 = scalar_lea.vmem %s21_s13, 64  ;;  %p161_p4 = scmp.lt.s32.totalorder %s21_s13, %s21_s13 }
   0xb   :  { %p157_p3 = scmp.ne.s32.totalorder %s21_s13, %s156_s23  ;;  %p162_p5 = scmp.lt.s32.totalorder %s156_s23, %s156_s23 }
   0xd   :  { %p163_p6 = por %p162_p5, %p161_p4 }
   0xf   :  { %p164_p7 = pnand %p163_p6, %p157_p3 }
  0x11   :  { %167 = shalt.err (!%p164_p7)
}
  0x12   :  { %23 = dma.hbm_to_vmem [thread:$0]  %s283_s0, 64, %s21_s13, [#allocation4]  }
  0x13   :  { %s168_s28 = scalar_lea.hbm %s284_s1, 64 }
  0x14   :  { %p169_p8 = scmp.ne.s32.totalorder %s284_s1, %s168_s28  ;;  %p172_p9 = scmp.lt.u32.totalorder %s168_s28, %s284_s1 }
  0x16   :  { %p174_p10 = pnand %p172_p9, %p169_p8 }
  0x18   :  { %177 = shalt.err (!%p174_p10)
}
  0x19   :  { %s178_s6 = scalar_lea.vmem %s34_s15, 64  ;;  %p183_p12 = scmp.lt.s32.totalorder %s34_s15, %s34_s15 }
  0x1a   :  { %p179_p11 = scmp.ne.s32.totalorder %s34_s15, %s178_s6  ;;  %p184_p13 = scmp.lt.s32.totalorder %s178_s6, %s178_s6 }
  0x1c   :  { %p185_p0 = por %p184_p13, %p183_p12 }
  0x1e   :  { %p186_p1 = pnand %p185_p0, %p179_p11 }
  0x20   :  { %189 = shalt.err (!%p186_p1)
}
  0x21   :  { %36 = dma.hbm_to_vmem [thread:$0]  %s284_s1, 64, %s34_s15, [#allocation7]  }
  0x22   :  { %212 = dma.done.wait [#allocation4], 64  }
  0x23   :  { %213 = vsyncadd [#allocation4], 4294967232 }
  0x24   :  { %214 = dma.done.wait [#allocation7], 64  }
  0x25   :  { %215 = vsyncadd [#allocation7], 4294967232  ;;  %v220_v0 = vmov 0.0   ;;  %v74_v1 = vld [vmem:[%s285_s2] sm:$0xf]  ;;  %vm81_vm0 = vcmask 1043456  }
  0x26   :  { %70 = vst [vmem:[#allocation2] sm:$0x1] %v220_v0  ;;  %73 = vst [vmem:[#allocation2 + $0x1] sm:$0x1] %v220_v0  ;;  %v75_v2 = vld [vmem:[#allocation3] sm:$0xf] }
  0x27   :  { %v91_v3 = vld [vmem:[#allocation6] sm:$0xf]  ;;  %v76_v4 = vsub.f32 %v75_v2, %v74_v1  ;;  %s221_s1 = smov [#allocation8]  }
  0x28   :  { %v92_v5 = vsub.f32 %v91_v3, %v74_v1  ;;  %s119_s2 = sshll.u32 %s221_s1, 4  ;;  %s120_s2 = int_to_ptr.vmem [resolvable:$true] %s119_s2 }
  0x29   :  { %v77_v6 = vmul.f32 %v76_v4, %v76_v4  ;;  %s190_s10 = scalar_lea.vmem %s120_s2, 32  ;;  %p195_p3 = scmp.lt.s32.totalorder %s120_s2, %s120_s2 }
  0x2a   :  { %v93_v7 = vmul.f32 %v92_v5, %v92_v5  ;;  %p191_p2 = scmp.ne.s32.totalorder %s120_s2, %s190_s10  ;;  %p196_p4 = scmp.lt.s32.totalorder %s190_s10, %s190_s10 }
  0x2b   :  { %v82_v8 = vsel %vm81_vm0, %v77_v6, 0.0 }
  0x2c   :  { %v97_v9 = vsel %vm81_vm0, %v93_v7, 0.0  ;;  %v83_v10 = vrot.slane %v82_v8, 4  ;;  %p197_p5 = por %p196_p4, %p195_p3 }
  0x2d   :  { %v98_v11 = vrot.slane %v97_v9, 4  ;;  %v80_v20 = vld [vmem:[#allocation2] sm:$0x1]  ;;  %v96_v21 = vld [vmem:[#allocation2 + $0x1] sm:$0x1] }
  0x2e   :  { %v84_v12 = vadd.f32 %v83_v10, %v82_v8  ;;  %p198_p6 = pnand %p197_p5, %p191_p2 }
  0x2f   :  { %v99_v13 = vadd.f32 %v98_v11, %v97_v9 }
  0x30   :  { %v85_v14 = vrot.slane %v84_v12, 2 }
  0x31   :  { %v100_v15 = vrot.slane %v99_v13, 2 }
  0x32   :  { %v86_v16 = vadd.f32 %v85_v14, %v84_v12 }
  0x33   :  { %v101_v17 = vadd.f32 %v100_v15, %v99_v13 }
  0x34   :  { %v87_v18 = vrot.slane %v86_v16, 1 }
  0x35   :  { %v102_v19 = vrot.slane %v101_v17, 1 }
  0x36   :  { %v88_v22 = vadd.f32 %v87_v18, %v86_v16 }
  0x37   :  { %v103_v23 = vadd.f32 %v102_v19, %v101_v17 }
  0x38   :  { %v89_v24 = vadd.f32 %v88_v22, %v80_v20 }
  0x39   :  { %v104_v25 = vadd.f32 %v103_v23, %v96_v21 }
  0x3a   :  { %90 = vst [vmem:[#allocation2] sm:$0x1] %v89_v24 }
  0x3b   :  { %105 = vst [vmem:[#allocation2 + $0x1] sm:$0x1] %v104_v25 }
  0x42   :  { %v109_v26 = vld [vmem:[#allocation2] sm:$0x3]  }
  0x43   :  { %110 = vst [vmem:[#allocation8] sm:$0x3] %v109_v26  }
  0x44   :  { %201 = shalt.err (!%p198_p6)
}
  0x45   :  { %s202_s13 = scalar_lea.hbm %s286_s3, 32 }
  0x46   :  { %p203_p7 = scmp.ne.s32.totalorder %s286_s3, %s202_s13  ;;  %p206_p8 = scmp.lt.u32.totalorder %s202_s13, %s286_s3 }
  0x48   :  { %p208_p9 = pnand %p206_p8, %p203_p7 }
  0x4a   :  { %211 = shalt.err (!%p208_p9)
}
  0x4b   :  { %s222_s18 = smov 16   ;;  %s223_s19 = smov 1  }
  0x4c   :  { %125 = dma.vmem_to_hbm [thread:$0]  %s120_s2, 32, %s286_s3, [#allocation5], %s222_s18, %s222_s18, %s223_s19  }
  0x4d   :  { %216 = dma.done.wait [#allocation5], 32  }
  0x4e   :  { %217 = vsyncadd [#allocation5], 4294967264 }
  0x4f   :  { %129 = vsyncpa [#allocation4], 1 }
  0x50   :  { %130 = vsyncpa [#allocation7], 1 }
  0x51   :  { %131 = vsyncpa [#allocation5], 1 }

</bundles_post_ra>
